<compile_context>
chip_gen: v5e
topology: v5e:2x2
jax: 0.10.0
libtpu: 0.0.40
codegen_flags: <defaults>
</compile_context>

<pallas_src>
import numpy as np
import jax
import jax.numpy as jnp
from jax.experimental import pallas as pl
from jax.experimental.pallas import tpu as pltpu


LD_LANES = 8  # compact log_det output width (broadcast across 8 lanes, col 0 is used)


def _round_up(n, m):
    return ((n + m - 1) // m) * m


def _pick_tb(B, tb_max=512):
    """Batch tile: as large as possible (amortize ~0.35us/step pipeline overhead) but
    keep >= 2 grid steps when the batch allows so both v7x TensorCores get work."""
    b8 = _round_up(max(B, 1), 8)
    half = _round_up(max(b8 // 2, 8), 8)
    return int(min(tb_max, half))


def maf_kernel(x_ref, w0_ref, b0_ref, w1_ref, b1_ref, w2_ref, b2_ref,
               w3s_ref, b3s_ref, w3t_ref, b3t_ref, z_ref, ld_ref):
    x = x_ref[...]                                                    # (TB, D) f32, natural width

    # MADE / ARMLP hot path: bf16 matmul operands, f32 accumulation on the MXU.
    h = jnp.dot(x.astype(jnp.bfloat16), w0_ref[...],
                preferred_element_type=jnp.float32) + b0_ref[...]
    h = jnp.maximum(h, 0.0)
    h = jnp.dot(h.astype(jnp.bfloat16), w1_ref[...],
                preferred_element_type=jnp.float32) + b1_ref[...]
    h = jnp.maximum(h, 0.0)
    h = jnp.dot(h.astype(jnp.bfloat16), w2_ref[...],
                preferred_element_type=jnp.float32) + b2_ref[...]
    h = jnp.maximum(h, 0.0)
    hb = h.astype(jnp.bfloat16)

    # Split head: two narrow-N matmuls producing the natural-width s and t directly.
    s = jnp.dot(hb, w3s_ref[...], preferred_element_type=jnp.float32) + b3s_ref[...]
    t = jnp.dot(hb, w3t_ref[...], preferred_element_type=jnp.float32) + b3t_ref[...]

    # Affine transform kept in f32.
    z_ref[...] = x * jnp.exp(s) + t                                   # (TB, D)

    # s has only real columns (no lane padding), so the full-row sum is exact.
    ld = jnp.sum(s, axis=1, keepdims=True)                            # (TB, 1)
    ld_ref[...] = jnp.broadcast_to(ld, ld_ref.shape)                  # (TB, 8) compact store


def make_maf_params(dim, nh, *, lane=128, seed=0):
    """Deterministic MADE masks (natural ordering, mask seed 0, as in ARMLP/MADE) plus
    deterministic synthetic weights.  Returns unpadded bf16 weights (reference) and the
    kernel operands: hidden width zero-padded to one lane tile, feature dims natural."""
    nhp = _round_up(nh, lane)        # hidden padded to one 128-lane tile; never 256 here

    # ---- MADE masks ----
    rng = np.random.RandomState(0)
    m_in = np.arange(dim)
    m_list = [m_in]
    for _ in range(3):
        m_list.append(rng.randint(m_list[-1].min(), dim - 1, size=nh))
    hidden_masks = [(m_list[l][:, None] <= m_list[l + 1][None, :]).astype(np.float32)
                    for l in range(3)]
    mask_out = (m_list[-1][:, None] < m_in[None, :]).astype(np.float32)     # (nh, dim)

    # ---- synthetic weights, (in, out) layout, pre-masked ----
    key = jax.random.PRNGKey(seed)
    dims = [dim, nh, nh, nh]
    ws, bs = [], []
    for li in range(3):
        key, kw, kb = jax.random.split(key, 3)
        w = jax.random.normal(kw, (dims[li], nh), jnp.float32) / np.sqrt(dims[li])
        b = 0.01 * jax.random.normal(kb, (1, nh), jnp.float32)
        ws.append(w * jnp.asarray(hidden_masks[li]))
        bs.append(b)
    key, kw, kb = jax.random.split(key, 3)
    w3 = jax.random.normal(kw, (nh, 2 * dim), jnp.float32) / np.sqrt(nh)
    b3 = 0.01 * jax.random.normal(kb, (1, 2 * dim), jnp.float32)
    w3 = w3 * jnp.asarray(np.concatenate([mask_out, mask_out], axis=1))
    w3s, w3t = w3[:, :dim], w3[:, dim:]
    b3s, b3t = b3[:, :dim], b3[:, dim:]

    ref = dict(ws=[w.astype(jnp.bfloat16) for w in ws], bs=bs,
               w3s=w3s.astype(jnp.bfloat16), b3s=b3s,
               w3t=w3t.astype(jnp.bfloat16), b3t=b3t)

    def pad(a, r, c, dtype):
        out = jnp.zeros((r, c), dtype)
        return out.at[:a.shape[0], :a.shape[1]].set(a.astype(dtype))

    packed = (pad(ws[0], dim, nhp, jnp.bfloat16), pad(bs[0], 1, nhp, jnp.float32),
              pad(ws[1], nhp, nhp, jnp.bfloat16), pad(bs[1], 1, nhp, jnp.float32),
              pad(ws[2], nhp, nhp, jnp.bfloat16), pad(bs[2], 1, nhp, jnp.float32),
              pad(w3s, nhp, dim, jnp.bfloat16),   b3s.astype(jnp.float32),
              pad(w3t, nhp, dim, jnp.bfloat16),   b3t.astype(jnp.float32))

    return dict(D=dim, NHp=nhp, packed=packed, ref=ref)


def maf_forward(x, params, parity, *, tb=None):
    """x: (B, D) f32.  Returns (z (B, D), log_det (B,))."""
    B, D = x.shape
    NHp = params["NHp"]
    packed = params["packed"]
    if tb is None:
        tb = _pick_tb(B)
    B_pad = _round_up(B, tb)

    x_pad = jnp.zeros((B_pad, D), jnp.float32).at[:B, :].set(x)

    grid = (B_pad // tb,)
    row_spec = lambda d: pl.BlockSpec((tb, d), lambda i: (i, 0))         # streamed tiles
    const_spec = lambda a: pl.BlockSpec(a.shape, lambda i: (0, 0))       # VMEM-resident

    # VMEM budget: resident weights + streamed tiles + hidden activations (+ headroom),
    # capped below v7x's 64 MiB per-TC physical VMEM.
    weight_bytes = sum(int(np.prod(a.shape)) * a.dtype.itemsize for a in packed)
    stream_bytes = 2 * (tb * D * 4) * 2 + 2 * (tb * LD_LANES * 4) + 8 * (tb * NHp * 4)
    vmem_limit = int(min(48 * 1024 * 1024,
                         max(16 * 1024 * 1024, 4 * (weight_bytes + stream_bytes))))

    flops = 2 * B_pad * (D * NHp + 2 * NHp * NHp + 2 * NHp * D) + 4 * B_pad * D
    bytes_accessed = B_pad * (D * 4 * 2 + LD_LANES * 4) + weight_bytes
    cost = pl.CostEstimate(flops=int(flops),
                           transcendentals=int(B_pad * D),
                           bytes_accessed=int(bytes_accessed))

    z_pad, ld_pad = pl.pallas_call(
        maf_kernel,
        out_shape=(jax.ShapeDtypeStruct((B_pad, D), jnp.float32),
                   jax.ShapeDtypeStruct((B_pad, LD_LANES), jnp.float32)),
        grid=grid,
        in_specs=[row_spec(D)] + [const_spec(a) for a in packed],
        out_specs=(row_spec(D), row_spec(LD_LANES)),
        compiler_params=pltpu.CompilerParams(
            dimension_semantics=("parallel",),
            vmem_limit_bytes=vmem_limit),
        cost_estimate=cost,
    )(x_pad, *packed)

    z = z_pad[:B, :]
    if parity:
        z = z[:, ::-1]               # pure data movement: cheaper outside the kernel
    log_det = ld_pad[:B, 0]
    return z, log_det


def maf_reference(x, ref, parity):
    """Pure-JAX reference mirroring the kernel's bf16-operand / f32-accumulate recipe."""
    h = x
    for w, b in zip(ref["ws"], ref["bs"]):
        h = jnp.maximum(jnp.dot(h.astype(jnp.bfloat16), w,
                                preferred_element_type=jnp.float32) + b, 0.0)
    hb = h.astype(jnp.bfloat16)
    s = jnp.dot(hb, ref["w3s"], preferred_element_type=jnp.float32) + ref["b3s"]
    t = jnp.dot(hb, ref["w3t"], preferred_element_type=jnp.float32) + ref["b3t"]
    z = x * jnp.exp(s) + t
    if parity:
        z = z[:, ::-1]
    return z, jnp.sum(s, axis=1)


if __name__ == "__main__":
    # Module-consistent small shapes: dim=8, nh=24 (MAF default); batch exercises the
    # grid (auto tb=128 -> 2 grid steps, so the "parallel" axis has work for 2 TCs).
    B, D, NH = 256, 8, 24
    PARITY = 1

    x = jax.random.normal(jax.random.PRNGKey(0), (B, D), jnp.float32)
    params = make_maf_params(D, NH)

    z, log_det = maf_forward(x, params, PARITY)
    z = jax.block_until_ready(z)
    log_det = jax.block_until_ready(log_det)

    z_ref, ld_ref = maf_reference(x, params["ref"], PARITY)
    assert z.shape == (B, D) and log_det.shape == (B,)
    np.testing.assert_allclose(np.asarray(z), np.asarray(z_ref), rtol=1e-2, atol=1e-2)
    np.testing.assert_allclose(np.asarray(log_det), np.asarray(ld_ref), rtol=1e-2, atol=1e-2)

    # TODO(synk): MAF.backward (sequential per-dimension inversion) is not part of the
    # forward pass and is intentionally not implemented here.
    print("KERNEL_OK")
</pallas_src>

<mosaic_0001>
module attributes {stable_mosaic.version = 11 : i64} {
  func.func @maf_kernel(%arg0: i32, %arg1: memref<128x8xf32, #tpu.memory_space<vmem>>, %arg2: memref<8x128xbf16, #tpu.memory_space<vmem>>, %arg3: memref<1x128xf32, #tpu.memory_space<vmem>>, %arg4: memref<128x128xbf16, #tpu.memory_space<vmem>>, %arg5: memref<1x128xf32, #tpu.memory_space<vmem>>, %arg6: memref<128x128xbf16, #tpu.memory_space<vmem>>, %arg7: memref<1x128xf32, #tpu.memory_space<vmem>>, %arg8: memref<128x8xbf16, #tpu.memory_space<vmem>>, %arg9: memref<1x8xf32, #tpu.memory_space<vmem>>, %arg10: memref<128x8xbf16, #tpu.memory_space<vmem>>, %arg11: memref<1x8xf32, #tpu.memory_space<vmem>>, %arg12: memref<128x8xf32, #tpu.memory_space<vmem>>, %arg13: memref<128x8xf32, #tpu.memory_space<vmem>>) attributes {dimension_semantics = [#tpu.dimension_semantics<parallel>], iteration_bounds = array<i64: 2>, scalar_prefetch = 0 : i64, scratch_operands = 0 : i64, tpu.core_type = #tpu.core_type<tc>, window_params = [{transform_indices = @transform_0, window_bounds = array<i64: 128, 8>}, {pipeline_mode = #tpu.pipeline_mode<synchronous>, transform_indices = @transform_1, window_bounds = array<i64: 8, 128>}, {pipeline_mode = #tpu.pipeline_mode<synchronous>, transform_indices = @transform_2, window_bounds = array<i64: 1, 128>}, {pipeline_mode = #tpu.pipeline_mode<synchronous>, transform_indices = @transform_3, window_bounds = array<i64: 128, 128>}, {pipeline_mode = #tpu.pipeline_mode<synchronous>, transform_indices = @transform_4, window_bounds = array<i64: 1, 128>}, {pipeline_mode = #tpu.pipeline_mode<synchronous>, transform_indices = @transform_5, window_bounds = array<i64: 128, 128>}, {pipeline_mode = #tpu.pipeline_mode<synchronous>, transform_indices = @transform_6, window_bounds = array<i64: 1, 128>}, {pipeline_mode = #tpu.pipeline_mode<synchronous>, transform_indices = @transform_7, window_bounds = array<i64: 128, 8>}, {pipeline_mode = #tpu.pipeline_mode<synchronous>, transform_indices = @transform_8, window_bounds = array<i64: 1, 8>}, {pipeline_mode = #tpu.pipeline_mode<synchronous>, transform_indices = @transform_9, window_bounds = array<i64: 128, 8>}, {pipeline_mode = #tpu.pipeline_mode<synchronous>, transform_indices = @transform_10, window_bounds = array<i64: 1, 8>}, {transform_indices = @transform_11, window_bounds = array<i64: 128, 8>}, {transform_indices = @transform_12, window_bounds = array<i64: 128, 8>}]} {
    %c0 = arith.constant 0 : index
    %c0_0 = arith.constant 0 : index
    %0 = vector.load %arg1[%c0, %c0_0] : memref<128x8xf32, #tpu.memory_space<vmem>>, vector<128x8xf32>
    %1 = arith.truncf %0 : vector<128x8xf32> to vector<128x8xbf16>
    %c0_1 = arith.constant 0 : index
    %c0_2 = arith.constant 0 : index
    %2 = vector.load %arg2[%c0_1, %c0_2] : memref<8x128xbf16, #tpu.memory_space<vmem>>, vector<8x128xbf16>
    %cst = arith.constant dense<0.000000e+00> : vector<128x128xf32>
    %3 = tpu.matmul %1, %2, %cst {dimension_numbers = #tpu.dot_dimension_numbers<[1], [0], [0], [1], [0, 0, 1, 1], [], []>} : vector<128x8xbf16>, vector<8x128xbf16>, vector<128x128xf32> -> vector<128x128xf32>
    %c0_3 = arith.constant 0 : index
    %c0_4 = arith.constant 0 : index
    %4 = vector.load %arg3[%c0_3, %c0_4] : memref<1x128xf32, #tpu.memory_space<vmem>>, vector<1x128xf32>
    %5 = vector.broadcast %4 : vector<1x128xf32> to vector<128x128xf32>
    %6 = arith.addf %3, %5 : vector<128x128xf32>
    %cst_5 = arith.constant 0.000000e+00 : f32
    %7 = vector.broadcast %cst_5 : f32 to vector<128x128xf32>
    %8 = arith.maximumf %6, %7 : vector<128x128xf32>
    %9 = arith.truncf %8 : vector<128x128xf32> to vector<128x128xbf16>
    %c0_6 = arith.constant 0 : index
    %c0_7 = arith.constant 0 : index
    %10 = vector.load %arg4[%c0_6, %c0_7] : memref<128x128xbf16, #tpu.memory_space<vmem>>, vector<128x128xbf16>
    %cst_8 = arith.constant dense<0.000000e+00> : vector<128x128xf32>
    %11 = tpu.matmul %9, %10, %cst_8 {dimension_numbers = #tpu.dot_dimension_numbers<[1], [0], [0], [1], [0, 0, 1, 1], [], []>} : vector<128x128xbf16>, vector<128x128xbf16>, vector<128x128xf32> -> vector<128x128xf32>
    %c0_9 = arith.constant 0 : index
    %c0_10 = arith.constant 0 : index
    %12 = vector.load %arg5[%c0_9, %c0_10] : memref<1x128xf32, #tpu.memory_space<vmem>>, vector<1x128xf32>
    %13 = vector.broadcast %12 : vector<1x128xf32> to vector<128x128xf32>
    %14 = arith.addf %11, %13 : vector<128x128xf32>
    %cst_11 = arith.constant 0.000000e+00 : f32
    %15 = vector.broadcast %cst_11 : f32 to vector<128x128xf32>
    %16 = arith.maximumf %14, %15 : vector<128x128xf32>
    %17 = arith.truncf %16 : vector<128x128xf32> to vector<128x128xbf16>
    %c0_12 = arith.constant 0 : index
    %c0_13 = arith.constant 0 : index
    %18 = vector.load %arg6[%c0_12, %c0_13] : memref<128x128xbf16, #tpu.memory_space<vmem>>, vector<128x128xbf16>
    %cst_14 = arith.constant dense<0.000000e+00> : vector<128x128xf32>
    %19 = tpu.matmul %17, %18, %cst_14 {dimension_numbers = #tpu.dot_dimension_numbers<[1], [0], [0], [1], [0, 0, 1, 1], [], []>} : vector<128x128xbf16>, vector<128x128xbf16>, vector<128x128xf32> -> vector<128x128xf32>
    %c0_15 = arith.constant 0 : index
    %c0_16 = arith.constant 0 : index
    %20 = vector.load %arg7[%c0_15, %c0_16] : memref<1x128xf32, #tpu.memory_space<vmem>>, vector<1x128xf32>
    %21 = vector.broadcast %20 : vector<1x128xf32> to vector<128x128xf32>
    %22 = arith.addf %19, %21 : vector<128x128xf32>
    %cst_17 = arith.constant 0.000000e+00 : f32
    %23 = vector.broadcast %cst_17 : f32 to vector<128x128xf32>
    %24 = arith.maximumf %22, %23 : vector<128x128xf32>
    %25 = arith.truncf %24 : vector<128x128xf32> to vector<128x128xbf16>
    %c0_18 = arith.constant 0 : index
    %c0_19 = arith.constant 0 : index
    %26 = vector.load %arg8[%c0_18, %c0_19] : memref<128x8xbf16, #tpu.memory_space<vmem>>, vector<128x8xbf16>
    %cst_20 = arith.constant dense<0.000000e+00> : vector<128x8xf32>
    %27 = tpu.matmul %25, %26, %cst_20 {dimension_numbers = #tpu.dot_dimension_numbers<[1], [0], [0], [1], [0, 0, 1, 1], [], []>} : vector<128x128xbf16>, vector<128x8xbf16>, vector<128x8xf32> -> vector<128x8xf32>
    %c0_21 = arith.constant 0 : index
    %c0_22 = arith.constant 0 : index
    %28 = vector.load %arg9[%c0_21, %c0_22] : memref<1x8xf32, #tpu.memory_space<vmem>>, vector<1x8xf32>
    %29 = vector.broadcast %28 : vector<1x8xf32> to vector<128x8xf32>
    %30 = arith.addf %27, %29 : vector<128x8xf32>
    %c0_23 = arith.constant 0 : index
    %c0_24 = arith.constant 0 : index
    %31 = vector.load %arg10[%c0_23, %c0_24] : memref<128x8xbf16, #tpu.memory_space<vmem>>, vector<128x8xbf16>
    %cst_25 = arith.constant dense<0.000000e+00> : vector<128x8xf32>
    %32 = tpu.matmul %25, %31, %cst_25 {dimension_numbers = #tpu.dot_dimension_numbers<[1], [0], [0], [1], [0, 0, 1, 1], [], []>} : vector<128x128xbf16>, vector<128x8xbf16>, vector<128x8xf32> -> vector<128x8xf32>
    %c0_26 = arith.constant 0 : index
    %c0_27 = arith.constant 0 : index
    %33 = vector.load %arg11[%c0_26, %c0_27] : memref<1x8xf32, #tpu.memory_space<vmem>>, vector<1x8xf32>
    %34 = vector.broadcast %33 : vector<1x8xf32> to vector<128x8xf32>
    %35 = arith.addf %32, %34 : vector<128x8xf32>
    %36 = math.exp %30 : vector<128x8xf32>
    %37 = arith.mulf %0, %36 : vector<128x8xf32>
    %38 = arith.addf %37, %35 : vector<128x8xf32>
    %c0_28 = arith.constant 0 : index
    %c0_29 = arith.constant 0 : index
    %39 = vector.load %arg12[%c0_28, %c0_29] : memref<128x8xf32, #tpu.memory_space<vmem>>, vector<128x8xf32>
    tpu.vector_store %arg12[%c0_28, %c0_29], %38 {strides = array<i32>} : memref<128x8xf32, #tpu.memory_space<vmem>>, vector<128x8xf32>,
    %cst_30 = arith.constant dense<0.000000e+00> : vector<128xf32>
    %40 = vector.multi_reduction <add>, %30, %cst_30 [1] : vector<128x8xf32> to vector<128xf32>
    %41 = vector.shape_cast %40 : vector<128xf32> to vector<128x1xf32>
    %42 = vector.shape_cast %41 : vector<128x1xf32> to vector<128x1xf32>
    %43 = vector.broadcast %42 : vector<128x1xf32> to vector<128x8xf32>
    %c0_31 = arith.constant 0 : index
    %c0_32 = arith.constant 0 : index
    %44 = vector.load %arg13[%c0_31, %c0_32] : memref<128x8xf32, #tpu.memory_space<vmem>>, vector<128x8xf32>
    tpu.vector_store %arg13[%c0_31, %c0_32], %43 {strides = array<i32>} : memref<128x8xf32, #tpu.memory_space<vmem>>, vector<128x8xf32>,
    return
  }
  func.func @transform_0(%arg0: i32) -> (i32, i32) {
    %c0_i32 = arith.constant 0 : i32
    %c0_i32_0 = arith.constant 0 : i32
    return %arg0, %c0_i32 : i32, i32
  }
  func.func @transform_1(%arg0: i32) -> (i32, i32) {
    %c0_i32 = arith.constant 0 : i32
    %c0_i32_0 = arith.constant 0 : i32
    %c0_i32_1 = arith.constant 0 : i32
    return %c0_i32, %c0_i32_0 : i32, i32
  }
  func.func @transform_2(%arg0: i32) -> (i32, i32) {
    %c0_i32 = arith.constant 0 : i32
    %c0_i32_0 = arith.constant 0 : i32
    %c0_i32_1 = arith.constant 0 : i32
    return %c0_i32, %c0_i32_0 : i32, i32
  }
  func.func @transform_3(%arg0: i32) -> (i32, i32) {
    %c0_i32 = arith.constant 0 : i32
    %c0_i32_0 = arith.constant 0 : i32
    %c0_i32_1 = arith.constant 0 : i32
    return %c0_i32, %c0_i32_0 : i32, i32
  }
  func.func @transform_4(%arg0: i32) -> (i32, i32) {
    %c0_i32 = arith.constant 0 : i32
    %c0_i32_0 = arith.constant 0 : i32
    %c0_i32_1 = arith.constant 0 : i32
    return %c0_i32, %c0_i32_0 : i32, i32
  }
  func.func @transform_5(%arg0: i32) -> (i32, i32) {
    %c0_i32 = arith.constant 0 : i32
    %c0_i32_0 = arith.constant 0 : i32
    %c0_i32_1 = arith.constant 0 : i32
    return %c0_i32, %c0_i32_0 : i32, i32
  }
  func.func @transform_6(%arg0: i32) -> (i32, i32) {
    %c0_i32 = arith.constant 0 : i32
    %c0_i32_0 = arith.constant 0 : i32
    %c0_i32_1 = arith.constant 0 : i32
    return %c0_i32, %c0_i32_0 : i32, i32
  }
  func.func @transform_7(%arg0: i32) -> (i32, i32) {
    %c0_i32 = arith.constant 0 : i32
    %c0_i32_0 = arith.constant 0 : i32
    %c0_i32_1 = arith.constant 0 : i32
    return %c0_i32, %c0_i32_0 : i32, i32
  }
  func.func @transform_8(%arg0: i32) -> (i32, i32) {
    %c0_i32 = arith.constant 0 : i32
    %c0_i32_0 = arith.constant 0 : i32
    %c0_i32_1 = arith.constant 0 : i32
    return %c0_i32, %c0_i32_0 : i32, i32
  }
  func.func @transform_9(%arg0: i32) -> (i32, i32) {
    %c0_i32 = arith.constant 0 : i32
    %c0_i32_0 = arith.constant 0 : i32
    %c0_i32_1 = arith.constant 0 : i32
    return %c0_i32, %c0_i32_0 : i32, i32
  }
  func.func @transform_10(%arg0: i32) -> (i32, i32) {
    %c0_i32 = arith.constant 0 : i32
    %c0_i32_0 = arith.constant 0 : i32
    %c0_i32_1 = arith.constant 0 : i32
    return %c0_i32, %c0_i32_0 : i32, i32
  }
  func.func @transform_11(%arg0: i32) -> (i32, i32) {
    %c0_i32 = arith.constant 0 : i32
    %c0_i32_0 = arith.constant 0 : i32
    return %arg0, %c0_i32 : i32, i32
  }
  func.func @transform_12(%arg0: i32) -> (i32, i32) {
    %c0_i32 = arith.constant 0 : i32
    %c0_i32_0 = arith.constant 0 : i32
    return %arg0, %c0_i32 : i32, i32
  }
}

</mosaic_0001>

<bundles_post_ra>
// kernel: tpu_custom_call.1
= control target key start
LH: loop header
LB: loop body
LE: loop exit
PB: predicated region body
PF: predicated region fallthrough
CT: control target
= control target key end

     0   :  { %s1615_s21 = smov 0   ;;  %s2018_s0 = inlined_call_operand.vmem [shape: f32[256,8], index: 0, kind: input, shape index: {}]   ;;  %s2019_s1 = inlined_call_operand.vmem [shape: bf16[8,128], index: 1, kind: input, shape index: {}]   ;;  %s2020_s2 = inlined_call_operand.vmem [shape: f32[1,128], index: 2, kind: input, shape index: {}]   ;;  %s2021_s3 = inlined_call_operand.vmem [shape: bf16[128,128], index: 3, kind: input, shape index: {}]   ;;  %s2022_s4 = inlined_call_operand.vmem [shape: f32[1,128], index: 4, kind: input, shape index: {}]   ;;  %s2023_s5 = inlined_call_operand.vmem [shape: bf16[128,128], index: 5, kind: input, shape index: {}]   ;;  %s2024_s6 = inlined_call_operand.vmem [shape: f32[1,128], index: 6, kind: input, shape index: {}]   ;;  %s2025_s7 = inlined_call_operand.vmem [shape: bf16[128,8], index: 7, kind: input, shape index: {}]   ;;  %s2026_s8 = inlined_call_operand.vmem [shape: f32[1,8], index: 8, kind: input, shape index: {}]   ;;  %s2027_s9 = inlined_call_operand.vmem [shape: bf16[128,8], index: 9, kind: input, shape index: {}]   ;;  %s2028_s10 = inlined_call_operand.vmem [shape: f32[1,8], index: 10, kind: input, shape index: {}]   ;;  %s2029_s11 = inlined_call_operand.vmem [shape: f32[256,8], index: 11, kind: output, shape index: {0}]   ;;  %s2030_s12 = inlined_call_operand.vmem [shape: f32[256,8], index: 12, kind: output, shape index: {1}]  }
   0x1 LB: > { %s1313_s22 = sadd.s32 4294967295, %s1548_s21   ;;  %p1317_p0 = scmp.ge.s32.totalorder %s1548_s21, 1  ;;  %s1548_s21 = sphi %s1615_s21, %s23_s21  }
   0x2   : > { %p366_p1 = scmp.lt.s32.totalorder %s1548_s21, 3 }
   0x4   : > { %p367_p2 = pnand %p1317_p0, %p366_p1 }
   0x5   : > { %s1318_s25 = sshll.u32 (!%p367_p2), %s1313_s22, 4 }
   0x6   : > { %370 = sbr.rel (%p367_p2) target bundleno = 815 (0x32f), region = 64  ;;  %p414_p3 = scmp.lt.s32.totalorder (!%p367_p2), %s1318_s25, 31 }
   0xb   : > { %v456_v0 = vld [vmem:[%s2019_s1] sm:$0xf]  ;;  %vm486_vm0 = vcmask 1043456   ;;  %s2032_s25 = smov (!%p414_p3, %s1318_s25), 31  ;;  %vm461_vm1 = vcmask 64512   ;;  %v1469_v13 = vld [vmem:[%s2021_s3 + $0x38] sm:$0xff] }
   0xc   : > { %v488_v1 = vsel %vm486_vm0, %v456_v0, 0  ;;  %s1626_s26 = sshll.u32 %s2032_s25, 3  ;;  %v1468_v15 = vld [vmem:[%s2021_s3 + $0x30] sm:$0xff]  ;;  %v1467_v18 = vld [vmem:[%s2021_s3 + $0x28] sm:$0xff]  ;;  %v1466_v25 = vld [vmem:[%s2021_s3 + $0x20] sm:$0xff] }
   0xd   : > { %497 = vmatpush.bf16.msra.mxu0 %v488_v1  ;;  %1494 = vmatpush.bf16.msra.mxu1 %v488_v1  ;;  %s1632_s29 = scalar_lea.vmem %s2018_s0, %s1626_s26  ;;  %v1465_v27 = vld [vmem:[%s2021_s3 + $0x18] sm:$0xff]  ;;  %v1464_v31 = vld [vmem:[%s2021_s3 + $0x10] sm:$0xff]  ;;  %v1463_v32 = vld [vmem:[%s2021_s3 + $0x8] sm:$0xff]  ;;  %s1885_s25 = scalar_lea.vmem %s2029_s11, %s1626_s26 }
   0xe   : > { %1495 = vmatpush.bf16.msra.mxu2 %v488_v1  ;;  %1496 = vmatpush.bf16.msra.mxu3 %v488_v1  ;;  %v1635_v2 = vld [vmem:[%s1632_s29] sm:$0xff]  ;;  %v1638_v3 = vld [vmem:[%s1632_s29 + $0x8] sm:$0xff]  ;;  %v1662_v11 = vld [vmem:[%s1632_s29 + $0x70] sm:$0xff]  ;;  %s1969_s30 = scalar_lea.vmem %s2030_s12, %s1626_s26 }
   0xf   : > { %v448_v4 = vpack.c.bf16 %v1638_v3, %v1635_v2  ;;  %v1643_v5 = vld [vmem:[%s1632_s29 + $0x20] sm:$0xff]  ;;  %v1646_v6 = vld [vmem:[%s1632_s29 + $0x28] sm:$0xff]  ;;  %v1665_v12 = vld [vmem:[%s1632_s29 + $0x78] sm:$0xff] }
  0x10   : > { %v450_v7 = vpack.c.bf16 %v1646_v6, %v1643_v5  ;;  %v1651_v8 = vld [vmem:[%s1632_s29 + $0x40] sm:$0xff]  ;;  %v1655_v9 = vld [vmem:[%s1632_s29 + $0x48] sm:$0xff]  ;;  %v455_v14 = vpack.c.bf16 %v1665_v12, %v1662_v11  ;;  %v1677_v16 = vld [vmem:[%s1632_s29 + $0x10] sm:$0xff] }
  0x11   : > { %1324 = vmatmul.msk.bf16.vlgmr.msra.gmra.mxu0 %vm461_vm1, %v448_v4  ;;  %v452_v10 = vpack.c.bf16 %v1655_v9, %v1651_v8  ;;  %631 = vmatpush.bf16.msrb.mxu1 %v1469_v13  ;;  %v1680_v17 = vld [vmem:[%s1632_s29 + $0x18] sm:$0xff]  ;;  %v1686_v19 = vld [vmem:[%s1632_s29 + $0x30] sm:$0xff]  ;;  %v1713_v28 = vld [vmem:[%s1632_s29 + $0x60] sm:$0xff] }
  0x12   : > { %1326 = vmatmul.msk.bf16.vlgmr.msra.gmra.mxu1 %vm461_vm1, %v450_v7  ;;  %1331 = vmatmul.msk.bf16.vlgmr.msra.gmra.mxu3 %vm461_vm1, %v455_v14  ;;  %v1689_v20 = vld [vmem:[%s1632_s29 + $0x38] sm:$0xff]  ;;  %v449_v21 = vpack.c.bf16 %v1680_v17, %v1677_v16  ;;  %v1694_v22 = vld [vmem:[%s1632_s29 + $0x50] sm:$0xff]  ;;  %v1716_v29 = vld [vmem:[%s1632_s29 + $0x68] sm:$0xff] }
  0x13   : > { %1328 = vmatmul.msk.bf16.vlgmr.msra.gmra.mxu2 %vm461_vm1, %v452_v10  ;;  %v1697_v23 = vld [vmem:[%s1632_s29 + $0x58] sm:$0xff]  ;;  %v451_v24 = vpack.c.bf16 %v1689_v20, %v1686_v19  ;;  %v454_v30 = vpack.c.bf16 %v1716_v29, %v1713_v28  ;;  %v1462_v33 = vld [vmem:[%s2021_s3] sm:$0xff] }
  0x14   : > { %v453_v26 = vpack.c.bf16 %v1697_v23, %v1694_v22  ;;  %v1733_v35 = vld [vmem:[%s2020_s2] ss:$0 sm:$0xff]  ;;  %v1477_v1 = vld [vmem:[%s2023_s5 + $0x38] sm:$0xff] }
  0x15   : > { %632 = vmatpush.bf16.msrb.mxu1 %v1468_v15  ;;  %772 = vmatpush.bf16.msrb.mxu2 %v1477_v1 }
  0x19   : > { %633 = vmatpush.bf16.msrb.mxu1 %v1467_v18 }
  0x1d   : > { %634 = vmatpush.bf16.msrb.mxu1 %v1466_v25 }
  0x21   : > { %1325 = vmatmul.msk.bf16.gmra.mxu0 %vm461_vm1, %v449_v21  ;;  %635 = vmatpush.bf16.msrb.mxu1 %v1465_v27  ;;  %v1476_v21 = vld [vmem:[%s2023_s5 + $0x30] sm:$0xff]  ;;  %v1474_v27 = vld [vmem:[%s2023_s5 + $0x20] sm:$0xff] }
  0x22   : > { %1327 = vmatmul.msk.bf16.gmra.mxu1 %vm461_vm1, %v451_v24  ;;  %773 = vmatpush.bf16.msrb.mxu2 %v1476_v21  ;;  %v1475_v24 = vld [vmem:[%s2023_s5 + $0x28] sm:$0xff] }
  0x23   : > { %1329 = vmatmul.msk.bf16.gmra.mxu2 %vm461_vm1, %v453_v26 }
  0x25   : > { %636 = vmatpush.bf16.msrb.mxu1 %v1464_v31 }
  0x26   : > { %774 = vmatpush.bf16.msrb.mxu2 %v1475_v24 }
  0x29   : > { %637 = vmatpush.bf16.msrb.mxu1 %v1463_v32 }
  0x2a   : > { %775 = vmatpush.bf16.msrb.mxu2 %v1474_v27 }
  0x2d   : > { %638 = vmatpush.bf16.msrb.mxu1 %v1462_v33 }
  0x33   : > { %1330 = vmatmul.msk.bf16.gmra.mxu2 %vm461_vm1, %v454_v30 }
  0x8e   : > { %v499_v34 = vpop.f32.mrf.mxu0 }
  0x8f   : > { %v500_v36 = vadd.f32 %v1733_v35, %v499_v34  ;;  %v509_v43 = vpop.f32.mrf.mxu1  ;;  %v1473_v34 = vld [vmem:[%s2023_s5 + $0x18] sm:$0xff] }
  0x90   : > { %v510_v51 = vadd.f32 %v1733_v35, %v509_v43  ;;  %776 = vmatpush.bf16.msrb.mxu2 %v1473_v34 }
  0x91   : > { %v539_v39 = vmax.f32 %v500_v36, 0.0  ;;  %v1472_v36 = vld [vmem:[%s2023_s5 + $0x10] sm:$0xff] }
  0x92   : > { %v543_v54 = vmax.f32 %v510_v51, 0.0 }
  0x94   : > { %777 = vmatpush.bf16.msrb.mxu2 %v1472_v36 }
  0x96   : > { %v501_v37 = vpop.f32.mrf.mxu0  ;;  %v519_v57 = vpop.f32.mrf.mxu2 }
  0x97   : > { %v502_v38 = vadd.f32 %v1733_v35, %v501_v37  ;;  %v511_v50 = vpop.f32.mrf.mxu1  ;;  %v520_v7 = vadd.f32 %v1733_v35, %v519_v57 }
  0x98   : > { %v512_v52 = vadd.f32 %v1733_v35, %v511_v50 }
  0x99   : > { %v540_v40 = vmax.f32 %v502_v38, 0.0  ;;  %v547_v13 = vmax.f32 %v520_v7, 0.0 }
  0x9a   : > { %v544_v55 = vmax.f32 %v512_v52, 0.0 }
  0x9b   : > { %v555_v41 = vpack.c.bf16 %v540_v40, %v539_v39  ;;  %v534_v40 = vpop.f32.mrf.mxu3 }
  0x9c   : > { %v557_v56 = vpack.c.bf16 %v544_v55, %v543_v54 }
  0x9d   : > { %639 = vmatmul.bf16.vlgmr.msrb.gmra.mxu1 %v555_v41 }
  0x9e   : > { %v504_v42 = vpop.f32.mrf.mxu0  ;;  %v521_v63 = vpop.f32.mrf.mxu2 }
  0x9f   : > { %v505_v44 = vadd.f32 %v1733_v35, %v504_v42  ;;  %v514_v53 = vpop.f32.mrf.mxu1  ;;  %v522_v10 = vadd.f32 %v1733_v35, %v521_v63 }
  0xa0   : > { %v515_v59 = vadd.f32 %v1733_v35, %v514_v53  ;;  %v1778_v53 = vld [vmem:[%s2022_s4] ss:$0 sm:$0xff] }
  0xa1   : > { %v541_v47 = vmax.f32 %v505_v44, 0.0  ;;  %v548_v14 = vmax.f32 %v522_v10, 0.0  ;;  %v1471_v44 = vld [vmem:[%s2023_s5 + $0x8] sm:$0xff] }
  0xa2   : > { %v545_v61 = vmax.f32 %v515_v59, 0.0  ;;  %778 = vmatpush.bf16.msrb.mxu2 %v1471_v44 }
  0xa3   : > { %v559_v15 = vpack.c.bf16 %v548_v14, %v547_v13 }
  0xa6   : > { %v506_v45 = vpop.f32.mrf.mxu0  ;;  %v524_v4 = vpop.f32.mrf.mxu2 }
  0xa7   : > { %v507_v46 = vadd.f32 %v1733_v35, %v506_v45  ;;  %v516_v58 = vpop.f32.mrf.mxu1  ;;  %v525_v25 = vadd.f32 %v1733_v35, %v524_v4  ;;  %v536_v45 = vpop.f32.mrf.mxu3 }
  0xa8   : > { %v517_v60 = vadd.f32 %v1733_v35, %v516_v58 }
  0xa9   : > { %v542_v48 = vmax.f32 %v507_v46, 0.0  ;;  %v549_v31 = vmax.f32 %v525_v25, 0.0  ;;  %v535_v46 = vadd.f32 %v1733_v35, %v534_v40 }
  0xaa   : > { %v546_v62 = vmax.f32 %v517_v60, 0.0 }
  0xab   : > { %v556_v49 = vpack.c.bf16 %v542_v48, %v541_v47  ;;  %v537_v47 = vadd.f32 %v1733_v35, %v536_v45  ;;  %v1470_v48 = vld [vmem:[%s2023_s5] sm:$0xff] }
  0xac   : > { %v558_v0 = vpack.c.bf16 %v546_v62, %v545_v61  ;;  %779 = vmatpush.bf16.msrb.mxu2 %v1470_v48  ;;  %v1493_v48 = vld [vmem:[%s2027_s9 + $0x38] sm:$0xff] }
  0xad   : > { %644 = vmatmul.bf16.gmra.mxu1 %v556_v49  ;;  %v553_v49 = vmax.f32 %v535_v46, 0.0  ;;  %v554_v50 = vmax.f32 %v537_v47, 0.0  ;;  %v1485_v47 = vld [vmem:[%s2025_s7 + $0x38] sm:$0xff]  ;;  %1030 = vmatpush.bf16.msrb.mxu0 %v1493_v48 }
  0xae   : > { %v526_v18 = vpop.f32.mrf.mxu2  ;;  %913 = vmatpush.bf16.msrb.mxu3 %v1485_v47 }
  0xaf   : > { %v527_v26 = vadd.f32 %v1733_v35, %v526_v18  ;;  %v562_v51 = vpack.c.bf16 %v554_v50, %v553_v49  ;;  %v1484_v50 = vld [vmem:[%s2025_s7 + $0x30] sm:$0xff] }
  0xb1   : > { %v550_v32 = vmax.f32 %v527_v26, 0.0 }
  0xb2   : > { %914 = vmatpush.bf16.msrb.mxu3 %v1484_v50 }
  0xb3   : > { %v560_v33 = vpack.c.bf16 %v550_v32, %v549_v31 }
  0xb6   : > { %v529_v30 = vpop.f32.mrf.mxu2 }
  0xb7   : > { %v530_v38 = vadd.f32 %v1733_v35, %v529_v30 }
  0xb9   : > { %v551_v41 = vmax.f32 %v530_v38, 0.0 }
  0xbd   : > { %649 = vmatmul.bf16.gmra.mxu1 %v557_v56 }
  0xbe   : > { %v531_v37 = vpop.f32.mrf.mxu2 }
  0xbf   : > { %v532_v39 = vadd.f32 %v1733_v35, %v531_v37 }
  0xc1   : > { %v552_v42 = vmax.f32 %v532_v39, 0.0 }
  0xc3   : > { %v561_v43 = vpack.c.bf16 %v552_v42, %v551_v41 }
  0xcd   : > { %654 = vmatmul.bf16.gmra.mxu1 %v558_v0 }
  0xdd   : > { %659 = vmatmul.bf16.gmra.mxu1 %v559_v15 }
  0xed   : > { %664 = vmatmul.bf16.gmra.mxu1 %v560_v33 }
  0xfd   : > { %669 = vmatmul.bf16.gmra.mxu1 %v561_v43 }
 0x10d   : > { %674 = vmatmul.bf16.gmra.mxu1 %v562_v51  ;;  %v1492_v51 = vld [vmem:[%s2027_s9 + $0x30] sm:$0xff] }
 0x10e   : > { %1031 = vmatpush.bf16.msrb.mxu0 %v1492_v51 }
 0x11a   : > { %v640_v52 = vpop.f32.mrf.mxu1 }
 0x11b   : > { %v641_v54 = vadd.f32 %v1778_v53, %v640_v52  ;;  %v1483_v52 = vld [vmem:[%s2025_s7 + $0x28] sm:$0xff] }
 0x11c   : > { %915 = vmatpush.bf16.msrb.mxu3 %v1483_v52 }
 0x11d   : > { %v680_v56 = vmax.f32 %v641_v54, 0.0  ;;  %v1491_v54 = vld [vmem:[%s2027_s9 + $0x28] sm:$0xff] }
 0x11e   : > { %1032 = vmatpush.bf16.msrb.mxu0 %v1491_v54 }
 0x122   : > { %v642_v55 = vpop.f32.mrf.mxu1 }
 0x123   : > { %v643_v35 = vadd.f32 %v1778_v53, %v642_v55 }
 0x125   : > { %v681_v57 = vmax.f32 %v643_v35, 0.0 }
 0x127   : > { %v696_v58 = vpack.c.bf16 %v681_v57, %v680_v56  ;;  %v1482_v57 = vld [vmem:[%s2025_s7 + $0x20] sm:$0xff] }
 0x128   : > { %916 = vmatpush.bf16.msrb.mxu3 %v1482_v57 }
 0x129   : > { %780 = vmatmul.bf16.vlgmr.msrb.gmra.mxu2 %v696_v58  ;;  %v1490_v58 = vld [vmem:[%s2027_s9 + $0x20] sm:$0xff] }
 0x12a   : > { %v645_v59 = vpop.f32.mrf.mxu1  ;;  %1033 = vmatpush.bf16.msrb.mxu0 %v1490_v58 }
 0x12b   : > { %v646_v60 = vadd.f32 %v1778_v53, %v645_v59 }
 0x12d   : > { %v682_v63 = vmax.f32 %v646_v60, 0.0 }
 0x132   : > { %v647_v61 = vpop.f32.mrf.mxu1 }
 0x133   : > { %v648_v62 = vadd.f32 %v1778_v53, %v647_v61 }
 0x135   : > { %v683_v0 = vmax.f32 %v648_v62, 0.0 }
 0x137   : > { %v697_v1 = vpack.c.bf16 %v683_v0, %v682_v63  ;;  %v1481_v63 = vld [vmem:[%s2025_s7 + $0x18] sm:$0xff] }
 0x138   : > { %v1489_v0 = vld [vmem:[%s2027_s9 + $0x18] sm:$0xff]  ;;  %917 = vmatpush.bf16.msrb.mxu3 %v1481_v63 }
 0x139   : > { %785 = vmatmul.bf16.gmra.mxu2 %v697_v1  ;;  %1034 = vmatpush.bf16.msrb.mxu0 %v1489_v0  ;;  %v1480_v1 = vld [vmem:[%s2025_s7 + $0x10] sm:$0xff] }
 0x13a   : > { %v650_v4 = vpop.f32.mrf.mxu1 }
 0x13b   : > { %v651_v7 = vadd.f32 %v1778_v53, %v650_v4  ;;  %v1488_v4 = vld [vmem:[%s2027_s9 + $0x10] sm:$0xff] }
 0x13c   : > { %918 = vmatpush.bf16.msrb.mxu3 %v1480_v1 }
 0x13d   : > { %v684_v14 = vmax.f32 %v651_v7, 0.0  ;;  %1035 = vmatpush.bf16.msrb.mxu0 %v1488_v4 }
 0x142   : > { %v652_v10 = vpop.f32.mrf.mxu1 }
 0x143   : > { %v653_v13 = vadd.f32 %v1778_v53, %v652_v10 }
 0x145   : > { %v685_v15 = vmax.f32 %v653_v13, 0.0  ;;  %v1479_v13 = vld [vmem:[%s2025_s7 + $0x8] sm:$0xff] }
 0x146   : > { %919 = vmatpush.bf16.msrb.mxu3 %v1479_v13 }
 0x147   : > { %v698_v18 = vpack.c.bf16 %v685_v15, %v684_v14  ;;  %v1487_v14 = vld [vmem:[%s2027_s9 + $0x8] sm:$0xff] }
 0x148   : > { %1036 = vmatpush.bf16.msrb.mxu0 %v1487_v14 }
 0x149   : > { %790 = vmatmul.bf16.gmra.mxu2 %v698_v18 }
 0x14a   : > { %v655_v21 = vpop.f32.mrf.mxu1 }
 0x14b   : > { %v656_v24 = vadd.f32 %v1778_v53, %v655_v21 }
 0x14d   : > { %v686_v27 = vmax.f32 %v656_v24, 0.0  ;;  %v1478_v24 = vld [vmem:[%s2025_s7] sm:$0xff] }
 0x14e   : > { %920 = vmatpush.bf16.msrb.mxu3 %v1478_v24 }
 0x152   : > { %v657_v25 = vpop.f32.mrf.mxu1 }
 0x153   : > { %v658_v26 = vadd.f32 %v1778_v53, %v657_v25  ;;  %v1486_v25 = vld [vmem:[%s2027_s9] sm:$0xff] }
 0x154   : > { %1037 = vmatpush.bf16.msrb.mxu0 %v1486_v25 }
 0x155   : > { %v687_v30 = vmax.f32 %v658_v26, 0.0 }
 0x157   : > { %v699_v31 = vpack.c.bf16 %v687_v30, %v686_v27 }
 0x159   : > { %795 = vmatmul.bf16.gmra.mxu2 %v699_v31 }
 0x15a   : > { %v660_v32 = vpop.f32.mrf.mxu1 }
 0x15b   : > { %v661_v33 = vadd.f32 %v1778_v53, %v660_v32 }
 0x15d   : > { %v688_v37 = vmax.f32 %v661_v33, 0.0 }
 0x162   : > { %v662_v34 = vpop.f32.mrf.mxu1 }
 0x163   : > { %v663_v36 = vadd.f32 %v1778_v53, %v662_v34 }
 0x165   : > { %v689_v38 = vmax.f32 %v663_v36, 0.0 }
 0x167   : > { %v700_v39 = vpack.c.bf16 %v689_v38, %v688_v37 }
 0x169   : > { %800 = vmatmul.bf16.gmra.mxu2 %v700_v39 }
 0x16a   : > { %v665_v40 = vpop.f32.mrf.mxu1 }
 0x16b   : > { %v666_v41 = vadd.f32 %v1778_v53, %v665_v40 }
 0x16d   : > { %v690_v44 = vmax.f32 %v666_v41, 0.0 }
 0x172   : > { %v667_v42 = vpop.f32.mrf.mxu1 }
 0x173   : > { %v668_v43 = vadd.f32 %v1778_v53, %v667_v42 }
 0x175   : > { %v691_v45 = vmax.f32 %v668_v43, 0.0 }
 0x177   : > { %v701_v46 = vpack.c.bf16 %v691_v45, %v690_v44 }
 0x179   : > { %805 = vmatmul.bf16.gmra.mxu2 %v701_v46 }
 0x17a   : > { %v670_v49 = vpop.f32.mrf.mxu1 }
 0x17b   : > { %v671_v55 = vadd.f32 %v1778_v53, %v670_v49 }
 0x17d   : > { %v692_v59 = vmax.f32 %v671_v55, 0.0 }
 0x182   : > { %v672_v35 = vpop.f32.mrf.mxu1 }
 0x183   : > { %v673_v56 = vadd.f32 %v1778_v53, %v672_v35 }
 0x185   : > { %v693_v60 = vmax.f32 %v673_v56, 0.0 }
 0x187   : > { %v702_v61 = vpack.c.bf16 %v693_v60, %v692_v59 }
 0x189   : > { %810 = vmatmul.bf16.gmra.mxu2 %v702_v61 }
 0x18a   : > { %v675_v62 = vpop.f32.mrf.mxu1 }
 0x18b   : > { %v676_v7 = vadd.f32 %v1778_v53, %v675_v62 }
 0x18d   : > { %v694_v18 = vmax.f32 %v676_v7, 0.0 }
 0x192   : > { %v677_v10 = vpop.f32.mrf.mxu1 }
 0x193   : > { %v678_v15 = vadd.f32 %v1778_v53, %v677_v10  ;;  %v1847_v53 = vld [vmem:[%s2024_s6] ss:$0 sm:$0xff] }
 0x195   : > { %v695_v21 = vmax.f32 %v678_v15, 0.0 }
 0x197   : > { %v703_v26 = vpack.c.bf16 %v695_v21, %v694_v18 }
 0x199   : > { %815 = vmatmul.bf16.gmra.mxu2 %v703_v26 }
 0x1ac   : > { %v781_v27 = vpop.f32.mrf.mxu2 }
 0x1ad   : > { %v782_v30 = vadd.f32 %v1847_v53, %v781_v27 }
 0x1af   : > { %v821_v33 = vmax.f32 %v782_v30, 0.0 }
 0x1b4   : > { %v783_v31 = vpop.f32.mrf.mxu2 }
 0x1b5   : > { %v784_v32 = vadd.f32 %v1847_v53, %v783_v31 }
 0x1b7   : > { %v822_v34 = vmax.f32 %v784_v32, 0.0 }
 0x1b9   : > { %v837_v36 = vpack.c.bf16 %v822_v34, %v821_v33 }
 0x1bb   : > { %921 = vmatmul.bf16.vlgmr.msrb.gmra.mxu3 %v837_v36  ;;  %1038 = vmatmul.bf16.vlgmr.msrb.gmra.mxu0 %v837_v36 }
 0x1bc   : > { %v786_v37 = vpop.f32.mrf.mxu2 }
 0x1bd   : > { %v787_v38 = vadd.f32 %v1847_v53, %v786_v37 }
 0x1bf   : > { %v823_v41 = vmax.f32 %v787_v38, 0.0 }
 0x1c4   : > { %v788_v39 = vpop.f32.mrf.mxu2 }
 0x1c5   : > { %v789_v40 = vadd.f32 %v1847_v53, %v788_v39 }
 0x1c7   : > { %v824_v42 = vmax.f32 %v789_v40, 0.0  ;;  %v1868_v40 = vld [vmem:[%s2026_s8] ss:$0 sm:$0xff] }
 0x1c9   : > { %v838_v43 = vpack.c.bf16 %v824_v42, %v823_v41 }
 0x1cb   : > { %926 = vmatmul.bf16.gmra.mxu3 %v838_v43  ;;  %1043 = vmatmul.bf16.gmra.mxu0 %v838_v43 }
 0x1cc   : > { %v791_v44 = vpop.f32.mrf.mxu2 }
 0x1cd   : > { %v792_v45 = vadd.f32 %v1847_v53, %v791_v44 }
 0x1cf   : > { %v825_v48 = vmax.f32 %v792_v45, 0.0 }
 0x1d4   : > { %v793_v46 = vpop.f32.mrf.mxu2 }
 0x1d5   : > { %v794_v47 = vadd.f32 %v1847_v53, %v793_v46 }
 0x1d7   : > { %v826_v49 = vmax.f32 %v794_v47, 0.0 }
 0x1d9   : > { %v839_v50 = vpack.c.bf16 %v826_v49, %v825_v48 }
 0x1db   : > { %931 = vmatmul.bf16.gmra.mxu3 %v839_v50  ;;  %1048 = vmatmul.bf16.gmra.mxu0 %v839_v50 }
 0x1dc   : > { %v796_v51 = vpop.f32.mrf.mxu2 }
 0x1dd   : > { %v797_v52 = vadd.f32 %v1847_v53, %v796_v51 }
 0x1df   : > { %v827_v35 = vmax.f32 %v797_v52, 0.0 }
 0x1e4   : > { %v798_v54 = vpop.f32.mrf.mxu2 }
 0x1e5   : > { %v799_v55 = vadd.f32 %v1847_v53, %v798_v54 }
 0x1e7   : > { %v828_v56 = vmax.f32 %v799_v55, 0.0 }
 0x1e9   : > { %v840_v57 = vpack.c.bf16 %v828_v56, %v827_v35 }
 0x1eb   : > { %936 = vmatmul.bf16.gmra.mxu3 %v840_v57  ;;  %1053 = vmatmul.bf16.gmra.mxu0 %v840_v57 }
 0x1ec   : > { %v801_v58 = vpop.f32.mrf.mxu2 }
 0x1ed   : > { %v802_v59 = vadd.f32 %v1847_v53, %v801_v58 }
 0x1ef   : > { %v829_v62 = vmax.f32 %v802_v59, 0.0 }
 0x1f4   : > { %v803_v60 = vpop.f32.mrf.mxu2 }
 0x1f5   : > { %v804_v61 = vadd.f32 %v1847_v53, %v803_v60 }
 0x1f7   : > { %v830_v63 = vmax.f32 %v804_v61, 0.0 }
 0x1f9   : > { %v841_v0 = vpack.c.bf16 %v830_v63, %v829_v62 }
 0x1fb   : > { %941 = vmatmul.bf16.gmra.mxu3 %v841_v0  ;;  %1058 = vmatmul.bf16.gmra.mxu0 %v841_v0 }
 0x1fc   : > { %v806_v1 = vpop.f32.mrf.mxu2 }
 0x1fd   : > { %v807_v4 = vadd.f32 %v1847_v53, %v806_v1 }
 0x1ff   : > { %v831_v13 = vmax.f32 %v807_v4, 0.0 }
 0x204   : > { %v808_v7 = vpop.f32.mrf.mxu2 }
 0x205   : > { %v809_v10 = vadd.f32 %v1847_v53, %v808_v7 }
 0x207   : > { %v832_v14 = vmax.f32 %v809_v10, 0.0 }
 0x209   : > { %v842_v15 = vpack.c.bf16 %v832_v14, %v831_v13 }
 0x20b   : > { %946 = vmatmul.bf16.gmra.mxu3 %v842_v15  ;;  %1063 = vmatmul.bf16.gmra.mxu0 %v842_v15 }
 0x20c   : > { %v811_v18 = vpop.f32.mrf.mxu2 }
 0x20d   : > { %v812_v21 = vadd.f32 %v1847_v53, %v811_v18 }
 0x20f   : > { %v833_v26 = vmax.f32 %v812_v21, 0.0 }
 0x214   : > { %v813_v24 = vpop.f32.mrf.mxu2 }
 0x215   : > { %v814_v25 = vadd.f32 %v1847_v53, %v813_v24 }
 0x217   : > { %v834_v27 = vmax.f32 %v814_v25, 0.0 }
 0x219   : > { %v843_v30 = vpack.c.bf16 %v834_v27, %v833_v26 }
 0x21b   : > { %951 = vmatmul.bf16.gmra.mxu3 %v843_v30  ;;  %1068 = vmatmul.bf16.gmra.mxu0 %v843_v30 }
 0x21c   : > { %v816_v31 = vpop.f32.mrf.mxu2 }
 0x21d   : > { %v817_v32 = vadd.f32 %v1847_v53, %v816_v31 }
 0x21f   : > { %v835_v36 = vmax.f32 %v817_v32, 0.0 }
 0x224   : > { %v818_v33 = vpop.f32.mrf.mxu2 }
 0x225   : > { %v819_v34 = vadd.f32 %v1847_v53, %v818_v33  ;;  %v1875_v53 = vld [vmem:[%s2028_s10] ss:$0 sm:$0xff] }
 0x227   : > { %v836_v37 = vmax.f32 %v819_v34, 0.0 }
 0x229   : > { %v844_v38 = vpack.c.bf16 %v836_v37, %v835_v36 }
 0x22b   : > { %956 = vmatmul.bf16.gmra.mxu3 %v844_v38  ;;  %1073 = vmatmul.bf16.gmra.mxu0 %v844_v38 }
 0x238   : > { %v1039_v39 = vpop.f32.mrf.mxu0 }
 0x239   : > { %v1040_v52 = vadd.f32 %v1875_v53, %v1039_v39 }
 0x23e   : > { %v922_v41 = vpop.f32.mrf.mxu3 }
 0x23f   : > { %v923_v42 = vadd.f32 %v1868_v40, %v922_v41 }
 0x240   : > { %v1041_v43 = vpop.f32.mrf.mxu0 }
 0x241   : > { %v1079_v44 = vmul.f32 1.442695, %v923_v42  ;;  %v1159_v45 = vsel %vm461_vm1, %v923_v42, 0.0  ;;  %v1042_v60 = vadd.f32 %v1875_v53, %v1041_v43 }
 0x242   : > { %1160 = vadd.xlane.f32.xlu0 %v1159_v45 }
 0x243   : > { %1510 = vpow2.f32 %v1079_v44 }
 0x246   : > { %v924_v46 = vpop.f32.mrf.mxu3 }
 0x247   : > { %v925_v47 = vadd.f32 %v1868_v40, %v924_v46 }
 0x248   : > { %v1044_v48 = vpop.f32.mrf.mxu0 }
 0x249   : > { %v1511_v49 = vpop.eup %1510  ;;  %v1081_v50 = vmul.f32 1.442695, %v925_v47  ;;  %v1162_v51 = vsel %vm461_vm1, %v925_v47, 0.0  ;;  %v1045_v13 = vadd.f32 %v1875_v53, %v1044_v48 }
 0x24a   : > { %v1111_v54 = vmul.f32 %v1511_v49, %v1635_v2  ;;  %1163 = vadd.xlane.f32.xlu0 %v1162_v51 }
 0x24b   : > { %1512 = vpow2.f32 %v1081_v50 }
 0x24c   : > { %v1127_v55 = vadd.f32 %v1111_v54, %v1040_v52 }
 0x24e   : > { %1143 = vst.msk [vmem:[%s1885_s25] sm:$0xff] %vm461_vm1, %v1127_v55  ;;  %v927_v35 = vpop.f32.mrf.mxu3 }
 0x24f   : > { %v928_v56 = vadd.f32 %v1868_v40, %v927_v35 }
 0x250   : > { %v1046_v57 = vpop.f32.mrf.mxu0 }
 0x251   : > { %v1513_v58 = vpop.eup %1512  ;;  %v1083_v59 = vmul.f32 1.442695, %v928_v56  ;;  %v1165_v2 = vsel %vm461_vm1, %v928_v56, 0.0  ;;  %v1047_v27 = vadd.f32 %v1875_v53, %v1046_v57 }
 0x252   : > { %v1112_v61 = vmul.f32 %v1513_v58, %v1638_v3  ;;  %1166 = vadd.xlane.f32.xlu1 %v1165_v2 }
 0x253   : > { %1514 = vpow2.f32 %v1083_v59 }
 0x254   : > { %v1128_v62 = vadd.f32 %v1112_v61, %v1042_v60 }
 0x256   : > { %1144 = vst.msk [vmem:[%s1885_s25 + $0x8] sm:$0xff] %vm461_vm1, %v1128_v62  ;;  %v929_v63 = vpop.f32.mrf.mxu3 }
 0x257   : > { %v930_v0 = vadd.f32 %v1868_v40, %v929_v63 }
 0x258   : > { %v1049_v1 = vpop.f32.mrf.mxu0 }
 0x259   : > { %v1515_v4 = vpop.eup %1514  ;;  %v1085_v7 = vmul.f32 1.442695, %v930_v0  ;;  %v1168_v10 = vsel %vm461_vm1, %v930_v0, 0.0  ;;  %v1050_v38 = vadd.f32 %v1875_v53, %v1049_v1 }
 0x25a   : > { %v1113_v14 = vmul.f32 %v1515_v4, %v1677_v16  ;;  %1169 = vadd.xlane.f32.xlu1 %v1168_v10 }
 0x25b   : > { %1516 = vpow2.f32 %v1085_v7 }
 0x25c   : > { %v1129_v3 = vadd.f32 %v1113_v14, %v1045_v13 }
 0x25e   : > { %1145 = vst.msk [vmem:[%s1885_s25 + $0x10] sm:$0xff] %vm461_vm1, %v1129_v3  ;;  %v932_v15 = vpop.f32.mrf.mxu3 }
 0x25f   : > { %v933_v18 = vadd.f32 %v1868_v40, %v932_v15 }
 0x260   : > { %v1051_v21 = vpop.f32.mrf.mxu0 }
 0x261   : > { %v1517_v24 = vpop.eup %1516  ;;  %v1087_v25 = vmul.f32 1.442695, %v933_v18  ;;  %v1171_v26 = vsel %vm461_vm1, %v933_v18, 0.0  ;;  %v1052_v47 = vadd.f32 %v1875_v53, %v1051_v21 }
 0x262   : > { %v1114_v30 = vmul.f32 %v1517_v24, %v1680_v17  ;;  %1172 = vadd.xlane.f32.xlu2 %v1171_v26 }
 0x263   : > { %1518 = vpow2.f32 %v1087_v25 }
 0x264   : > { %v1130_v16 = vadd.f32 %v1114_v30, %v1047_v27 }
 0x266   : > { %1146 = vst.msk [vmem:[%s1885_s25 + $0x18] sm:$0xff] %vm461_vm1, %v1130_v16  ;;  %v934_v31 = vpop.f32.mrf.mxu3 }
 0x267   : > { %v935_v32 = vadd.f32 %v1868_v40, %v934_v31 }
 0x268   : > { %v1054_v33 = vpop.f32.mrf.mxu0 }
 0x269   : > { %v1519_v34 = vpop.eup %1518  ;;  %v1089_v36 = vmul.f32 1.442695, %v935_v32  ;;  %v1174_v37 = vsel %vm461_vm1, %v935_v32, 0.0  ;;  %v1055_v35 = vadd.f32 %v1875_v53, %v1054_v33 }
 0x26a   : > { %v1115_v39 = vmul.f32 %v1519_v34, %v1643_v5  ;;  %1175 = vadd.xlane.f32.xlu2 %v1174_v37 }
 0x26b   : > { %1520 = vpow2.f32 %v1089_v36 }
 0x26c   : > { %v1131_v17 = vadd.f32 %v1115_v39, %v1050_v38 }
 0x26e   : > { %1147 = vst.msk [vmem:[%s1885_s25 + $0x20] sm:$0xff] %vm461_vm1, %v1131_v17  ;;  %v937_v41 = vpop.f32.mrf.mxu3 }
 0x26f   : > { %v938_v42 = vadd.f32 %v1868_v40, %v937_v41 }
 0x270   : > { %v1056_v43 = vpop.f32.mrf.mxu0 }
 0x271   : > { %v1521_v44 = vpop.eup %1520  ;;  %v1091_v45 = vmul.f32 1.442695, %v938_v42  ;;  %v1177_v46 = vsel %vm461_vm1, %v938_v42, 0.0  ;;  %v1057_v61 = vadd.f32 %v1875_v53, %v1056_v43 }
 0x272   : > { %v1116_v48 = vmul.f32 %v1521_v44, %v1646_v6  ;;  %1178 = vadd.xlane.f32.xlu0 %v1177_v46 }
 0x273   : > { %1522 = vpow2.f32 %v1091_v45 }
 0x274   : > { %v1132_v5 = vadd.f32 %v1116_v48, %v1052_v47 }
 0x276   : > { %1148 = vst.msk [vmem:[%s1885_s25 + $0x28] sm:$0xff] %vm461_vm1, %v1132_v5  ;;  %v939_v49 = vpop.f32.mrf.mxu3 }
 0x277   : > { %v940_v50 = vadd.f32 %v1868_v40, %v939_v49 }
 0x278   : > { %v1059_v54 = vpop.f32.mrf.mxu0 }
 0x279   : > { %v1523_v51 = vpop.eup %1522  ;;  %v1093_v52 = vmul.f32 1.442695, %v940_v50  ;;  %v1180_v55 = vsel %vm461_vm1, %v940_v50, 0.0  ;;  %v1060_v13 = vadd.f32 %v1875_v53, %v1059_v54 }
 0x27a   : > { %v1117_v56 = vmul.f32 %v1523_v51, %v1686_v19  ;;  %1181 = vadd.xlane.f32.xlu1 %v1180_v55 }
 0x27b   : > { %1524 = vpow2.f32 %v1093_v52 }
 0x27c   : > { %v1133_v6 = vadd.f32 %v1117_v56, %v1055_v35 }
 0x27e   : > { %1149 = vst.msk [vmem:[%s1885_s25 + $0x30] sm:$0xff] %vm461_vm1, %v1133_v6  ;;  %v942_v57 = vpop.f32.mrf.mxu3 }
 0x27f   : > { %v943_v58 = vadd.f32 %v1868_v40, %v942_v57 }
 0x280   : > { %v1061_v19 = vpop.f32.mrf.mxu0 }
 0x281   : > { %v1525_v59 = vpop.eup %1524  ;;  %v1095_v2 = vmul.f32 1.442695, %v943_v58  ;;  %v1183_v60 = vsel %vm461_vm1, %v943_v58, 0.0  ;;  %v1062_v26 = vadd.f32 %v1875_v53, %v1061_v19 }
 0x282   : > { %v1118_v62 = vmul.f32 %v1525_v59, %v1689_v20  ;;  %1184 = vadd.xlane.f32.xlu2 %v1183_v60 }
 0x283   : > { %1526 = vpow2.f32 %v1095_v2 }
 0x284   : > { %v1134_v63 = vadd.f32 %v1118_v62, %v1057_v61 }
 0x286   : > { %1150 = vst.msk [vmem:[%s1885_s25 + $0x38] sm:$0xff] %vm461_vm1, %v1134_v63  ;;  %v944_v0 = vpop.f32.mrf.mxu3 }
 0x287   : > { %v945_v1 = vadd.f32 %v1868_v40, %v944_v0 }
 0x288   : > { %v1064_v3 = vpop.f32.mrf.mxu0 }
 0x289   : > { %v1527_v4 = vpop.eup %1526  ;;  %v1097_v7 = vmul.f32 1.442695, %v945_v1  ;;  %v1186_v10 = vsel %vm461_vm1, %v945_v1, 0.0  ;;  %v1065_v36 = vadd.f32 %v1875_v53, %v1064_v3 }
 0x28a   : > { %v1119_v14 = vmul.f32 %v1527_v4, %v1651_v8  ;;  %1187 = vadd.xlane.f32.xlu0 %v1186_v10 }
 0x28b   : > { %1528 = vpow2.f32 %v1097_v7 }
 0x28c   : > { %v1135_v20 = vadd.f32 %v1119_v14, %v1060_v13 }
 0x28e   : > { %1151 = vst.msk [vmem:[%s1885_s25 + $0x40] sm:$0xff] %vm461_vm1, %v1135_v20  ;;  %v947_v15 = vpop.f32.mrf.mxu3 }
 0x28f   : > { %v948_v18 = vadd.f32 %v1868_v40, %v947_v15 }
 0x290   : > { %v1066_v16 = vpop.f32.mrf.mxu0 }
 0x291   : > { %v1529_v21 = vpop.eup %1528  ;;  %v1099_v24 = vmul.f32 1.442695, %v948_v18  ;;  %v1189_v25 = vsel %vm461_vm1, %v948_v18, 0.0  ;;  %v1067_v44 = vadd.f32 %v1875_v53, %v1066_v16 }
 0x292   : > { %v1120_v27 = vmul.f32 %v1529_v21, %v1655_v9  ;;  %1190 = vadd.xlane.f32.xlu1 %v1189_v25 }
 0x293   : > { %1530 = vpow2.f32 %v1099_v24 }
 0x294   : > { %v1136_v8 = vadd.f32 %v1120_v27, %v1062_v26 }
 0x296   : > { %1152 = vst.msk [vmem:[%s1885_s25 + $0x48] sm:$0xff] %vm461_vm1, %v1136_v8  ;;  %v949_v30 = vpop.f32.mrf.mxu3 }
 0x297   : > { %v950_v31 = vadd.f32 %v1868_v40, %v949_v30 }
 0x298   : > { %v1069_v41 = vpop.f32.mrf.mxu0 }
 0x299   : > { %v1531_v32 = vpop.eup %1530  ;;  %v1101_v33 = vmul.f32 1.442695, %v950_v31  ;;  %v1192_v34 = vsel %vm461_vm1, %v950_v31, 0.0  ;;  %v1070_v50 = vadd.f32 %v1875_v53, %v1069_v41 }
 0x29a   : > { %v1121_v37 = vmul.f32 %v1531_v32, %v1694_v22  ;;  %1193 = vadd.xlane.f32.xlu2 %v1192_v34 }
 0x29b   : > { %1532 = vpow2.f32 %v1101_v33 }
 0x29c   : > { %v1137_v9 = vadd.f32 %v1121_v37, %v1065_v36 }
 0x29e   : > { %1153 = vst.msk [vmem:[%s1885_s25 + $0x50] sm:$0xff] %vm461_vm1, %v1137_v9  ;;  %v952_v38 = vpop.f32.mrf.mxu3 }
 0x29f   : > { %v953_v39 = vadd.f32 %v1868_v40, %v952_v38 }
 0x2a1   : > { %v1533_v17 = vpop.eup %1532  ;;  %v1103_v42 = vmul.f32 1.442695, %v953_v39  ;;  %v1195_v43 = vsel %vm461_vm1, %v953_v39, 0.0 }
 0x2a2   : > { %v1122_v45 = vmul.f32 %v1533_v17, %v1697_v23  ;;  %1196 = vadd.xlane.f32.xlu0 %v1195_v43  ;;  %v1071_v23 = vpop.f32.mrf.mxu0 }
 0x2a3   : > { %1534 = vpow2.f32 %v1103_v42  ;;  %v1072_v57 = vadd.f32 %v1875_v53, %v1071_v23 }
 0x2a4   : > { %v1138_v22 = vadd.f32 %v1122_v45, %v1067_v44 }
 0x2a6   : > { %1154 = vst.msk [vmem:[%s1885_s25 + $0x58] sm:$0xff] %vm461_vm1, %v1138_v22  ;;  %v954_v46 = vpop.f32.mrf.mxu3 }
 0x2a7   : > { %v955_v47 = vadd.f32 %v1868_v40, %v954_v46 }
 0x2a9   : > { %v1535_v48 = vpop.eup %1534  ;;  %v1105_v5 = vmul.f32 1.442695, %v955_v47  ;;  %v1198_v49 = vsel %vm461_vm1, %v955_v47, 0.0 }
 0x2aa   : > { %v1123_v51 = vmul.f32 %v1535_v48, %v1713_v28  ;;  %1199 = vadd.xlane.f32.xlu1 %v1198_v49  ;;  %v1074_v59 = vpop.f32.mrf.mxu0 }
 0x2ab   : > { %1536 = vpow2.f32 %v1105_v5  ;;  %v1075_v63 = vadd.f32 %v1875_v53, %v1074_v59 }
 0x2ac   : > { %v1139_v52 = vadd.f32 %v1123_v51, %v1070_v50 }
 0x2ae   : > { %1155 = vst.msk [vmem:[%s1885_s25 + $0x60] sm:$0xff] %vm461_vm1, %v1139_v52  ;;  %v957_v54 = vpop.f32.mrf.mxu3 }
 0x2af   : > { %v958_v55 = vadd.f32 %v1868_v40, %v957_v54 }
 0x2b1   : > { %v1537_v35 = vpop.eup %1536  ;;  %v1107_v56 = vmul.f32 1.442695, %v958_v55  ;;  %v1201_v6 = vsel %vm461_vm1, %v958_v55, 0.0 }
 0x2b2   : > { %v1124_v58 = vmul.f32 %v1537_v35, %v1716_v29  ;;  %1202 = vadd.xlane.f32.xlu2 %v1201_v6 }
 0x2b3   : > { %1538 = vpow2.f32 %v1107_v56 }
 0x2b4   : > { %v1140_v28 = vadd.f32 %v1124_v58, %v1072_v57 }
 0x2b5   : > { %v1161_v2 = vpop.xlane.xlu0 %1160 }
 0x2b6   : > { %1156 = vst.msk [vmem:[%s1885_s25 + $0x68] sm:$0xff] %vm461_vm1, %v1140_v28  ;;  %v959_v60 = vpop.f32.mrf.mxu3 }
 0x2b7   : > { %1207 = vst.msk [vmem:[%s1969_s30] sm:$0xff] %vm461_vm1, %v1161_v2  ;;  %v960_v29 = vadd.f32 %v1868_v40, %v959_v60  ;;  %v1076_v40 = vpop.f32.mrf.mxu0 }
 0x2b8   : > { %v1077_v10 = vadd.f32 %v1875_v53, %v1076_v40 }
 0x2b9   : > { %v1539_v61 = vpop.eup %1538  ;;  %v1109_v62 = vmul.f32 1.442695, %v960_v29  ;;  %v1204_v19 = vsel %vm461_vm1, %v960_v29, 0.0 }
 0x2ba   : > { %v1125_v0 = vmul.f32 %v1539_v61, %v1662_v11  ;;  %1205 = vadd.xlane.f32.xlu0 %v1204_v19 }
 0x2bb   : > { %1540 = vpow2.f32 %v1109_v62 }
 0x2bc   : > { %v1141_v1 = vadd.f32 %v1125_v0, %v1075_v63 }
 0x2bd   : > { %v1164_v4 = vpop.xlane.xlu0 %1163 }
 0x2be   : > { %1157 = vst.msk [vmem:[%s1885_s25 + $0x70] sm:$0xff] %vm461_vm1, %v1141_v1 }
 0x2bf   : > { %1208 = vst.msk [vmem:[%s1969_s30 + $0x8] sm:$0xff] %vm461_vm1, %v1164_v4 }
 0x2c1   : > { %v1541_v7 = vpop.eup %1540 }
 0x2c2   : > { %v1126_v13 = vmul.f32 %v1541_v7, %v1665_v12 }
 0x2c4   : > { %v1142_v11 = vadd.f32 %v1126_v13, %v1077_v10 }
 0x2c5   : > { %v1167_v14 = vpop.xlane.xlu1 %1166 }
 0x2c6   : > { %1158 = vst.msk [vmem:[%s1885_s25 + $0x78] sm:$0xff] %vm461_vm1, %v1142_v11 }
 0x2c7   : > { %1209 = vst.msk [vmem:[%s1969_s30 + $0x10] sm:$0xff] %vm461_vm1, %v1167_v14 }
 0x2cd   : > { %v1170_v20 = vpop.xlane.xlu1 %1169 }
 0x2ce   : > { %1210 = vst.msk [vmem:[%s1969_s30 + $0x18] sm:$0xff] %vm461_vm1, %v1170_v20 }
 0x2d5   : > { %v1173_v3 = vpop.xlane.xlu2 %1172 }
 0x2d6   : > { %1211 = vst.msk [vmem:[%s1969_s30 + $0x20] sm:$0xff] %vm461_vm1, %v1173_v3 }
 0x2dd   : > { %v1176_v53 = vpop.xlane.xlu2 %1175 }
 0x2de   : > { %1212 = vst.msk [vmem:[%s1969_s30 + $0x28] sm:$0xff] %vm461_vm1, %v1176_v53 }
 0x2e5   : > { %v1179_v12 = vpop.xlane.xlu0 %1178 }
 0x2e6   : > { %1213 = vst.msk [vmem:[%s1969_s30 + $0x30] sm:$0xff] %vm461_vm1, %v1179_v12 }
 0x2ed   : > { %v1182_v15 = vpop.xlane.xlu1 %1181 }
 0x2ee   : > { %1214 = vst.msk [vmem:[%s1969_s30 + $0x38] sm:$0xff] %vm461_vm1, %v1182_v15 }
 0x2f5   : > { %v1185_v18 = vpop.xlane.xlu2 %1184 }
 0x2f6   : > { %1215 = vst.msk [vmem:[%s1969_s30 + $0x40] sm:$0xff] %vm461_vm1, %v1185_v18 }
 0x2fd   : > { %v1188_v21 = vpop.xlane.xlu0 %1187 }
 0x2fe   : > { %1216 = vst.msk [vmem:[%s1969_s30 + $0x48] sm:$0xff] %vm461_vm1, %v1188_v21 }
 0x305   : > { %v1191_v24 = vpop.xlane.xlu1 %1190 }
 0x306   : > { %1217 = vst.msk [vmem:[%s1969_s30 + $0x50] sm:$0xff] %vm461_vm1, %v1191_v24 }
 0x30d   : > { %v1194_v25 = vpop.xlane.xlu2 %1193 }
 0x30e   : > { %1218 = vst.msk [vmem:[%s1969_s30 + $0x58] sm:$0xff] %vm461_vm1, %v1194_v25 }
 0x315   : > { %v1197_v26 = vpop.xlane.xlu0 %1196 }
 0x316   : > { %1219 = vst.msk [vmem:[%s1969_s30 + $0x60] sm:$0xff] %vm461_vm1, %v1197_v26 }
 0x31d   : > { %v1200_v27 = vpop.xlane.xlu1 %1199 }
 0x31e   : > { %1220 = vst.msk [vmem:[%s1969_s30 + $0x68] sm:$0xff] %vm461_vm1, %v1200_v27 }
 0x325   : > { %v1203_v8 = vpop.xlane.xlu2 %1202 }
 0x326   : > { %1221 = vst.msk [vmem:[%s1969_s30 + $0x70] sm:$0xff] %vm461_vm1, %v1203_v8 }
 0x32d   : > { %v1206_v30 = vpop.xlane.xlu0 %1205 }
 0x32e   : > { %1222 = vst.msk [vmem:[%s1969_s30 + $0x78] sm:$0xff] %vm461_vm1, %v1206_v30 }
 0x32f PF: > { %s23_s21 = sadd.s32 1, %s1548_s21  }
 0x330   : > { %p20_p4 = scmp.ge.s32.totalorder %s23_s21, 4  }
 0x332   :  { %22 = sbr.rel (!%p20_p4) target bundleno = 1 (0x1), region = 106 }

</bundles_post_ra>
